<compile_context>
chip_gen: v5e
topology: v5e:2x2
jax: 0.10.0
libtpu: 0.0.40
codegen_flags: <defaults>
</compile_context>

<pallas_src>
import functools

import jax
import jax.numpy as jnp
from jax.experimental import pallas as pl
from jax.experimental.pallas import tpu as pltpu


def _round_up(v, m):
    return ((v + m - 1) // m) * m


def patch_embed_kernel(a_ref, w_ref, b_ref, o_ref):
    # a_ref: (tm, K) patch-matrix tile, w_ref: (K, E) weight (resident),
    # b_ref: (1, E) bias f32 (resident), o_ref: (tm, E) output tile.
    acc = jnp.dot(a_ref[...], w_ref[...], preferred_element_type=jnp.float32)
    o_ref[...] = (acc + b_ref[...]).astype(o_ref.dtype)


def _pick_tm(M, K, E, compute_itemsize, out_itemsize,
             tm_max=2048, vmem_budget=48 << 20):
    """Largest row tile (multiple of 8) that fits the VMEM budget with
    double-buffered A/out tiles and resident W/bias, while keeping >= ~4 grid
    steps when M allows it (2 blocks per TensorCore on v7x)."""
    per_row = 2 * (K * compute_itemsize + E * out_itemsize)
    resident = K * E * compute_itemsize + E * 4
    cap = (vmem_budget - resident) // per_row
    cap = max(8, min(tm_max, (cap // 8) * 8))
    if M >= 4 * cap:
        return cap
    tm = max(8, _round_up(-(-M // 4), 8))   # aim for ~4 grid steps
    return min(tm, cap)


@functools.partial(jax.jit,
                   static_argnames=("patch_size", "compute_dtype", "out_dtype"))
def patch_embed_voxel(x, weight, bias, *, patch_size,
                      compute_dtype=jnp.bfloat16, out_dtype=jnp.float32):
    """x: (B, C, X, Y, Z); weight: (E, C, p, p, p); bias: (E,).

    Returns (B, num_patches, E) in `out_dtype`, equivalent to
    nn.Conv3d(C, E, p, stride=p)(x.float()).flatten(2).transpose(1, 2)
    with the matmul inputs rounded to `compute_dtype` (f32 accumulation).
    Pass compute_dtype=jnp.float32 for exact-f32 conv semantics.
    """
    p = patch_size
    B, C, X, Y, Z = x.shape
    E = weight.shape[0]
    gx, gy, gz = X // p, Y // p, Z // p
    n_patches = gx * gy * gz
    K = C * p * p * p
    M = B * n_patches

    # Cast to the MXU compute dtype early: halves the patch-extraction and
    # operand-DMA bytes on an HBM-bound op (when compute_dtype is bf16).
    xc = x.astype(compute_dtype)

    # ---- glue: extract non-overlapping patches, feature order (c, dx, dy, dz)
    a = xc.reshape(B, C, gx, p, gy, p, gz, p)
    a = a.transpose(0, 2, 4, 6, 1, 3, 5, 7)          # (B, gx, gy, gz, C, p, p, p)
    a = a.reshape(M, K)                               # (M, K), no K padding

    w = weight.astype(compute_dtype).reshape(E, K).T  # (K, E)
    b = bias.astype(jnp.float32).reshape(1, E)        # (1, E)

    compute_itemsize = jnp.dtype(compute_dtype).itemsize
    out_itemsize = jnp.dtype(out_dtype).itemsize

    tm = _pick_tm(M, K, E, compute_itemsize, out_itemsize)
    grid = (pl.cdiv(M, tm),)   # partial final block: OOB rows masked on store

    cost = pl.CostEstimate(
        flops=2 * M * K * E,
        transcendentals=0,
        bytes_accessed=(M * K * compute_itemsize      # A
                        + K * E * compute_itemsize    # W
                        + E * 4                       # bias
                        + M * E * out_itemsize),      # out
    )

    out = pl.pallas_call(
        patch_embed_kernel,
        out_shape=jax.ShapeDtypeStruct((M, E), out_dtype),
        grid_spec=pltpu.PrefetchScalarGridSpec(
            num_scalar_prefetch=0,
            grid=grid,
            in_specs=[
                pl.BlockSpec((tm, K), lambda i: (i, 0)),   # A row tile
                pl.BlockSpec((K, E), lambda i: (0, 0)),    # W resident
                pl.BlockSpec((1, E), lambda i: (0, 0)),    # bias resident
            ],
            out_specs=pl.BlockSpec((tm, E), lambda i: (i, 0)),
        ),
        compiler_params=pltpu.CompilerParams(
            dimension_semantics=("parallel",),
            # Let XLA fuse the patch-extraction transpose chain into the
            # pallas operand for input 0 (avoids an HBM->HBM round trip).
            allow_input_fusion=[True, False, False],
            # Large tiles need more than the 16/32 MiB scoped defaults on
            # v5e/v6e; 64 MiB stays within physical VMEM on every generation.
            vmem_limit_bytes=64 << 20,
        ),
        cost_estimate=cost,
    )(a, w, b)

    return out.reshape(B, n_patches, E)


if __name__ == "__main__":
    # Small config consistent with the module: voxel_size=16, patch_size=4,
    # in_chans=3, embed_dim=128 -> num_patches = 4*4*4 = 64, M = 128.
    B, C = 2, 3
    voxel_size, patch_size, embed_dim = 16, 4, 128

    key = jax.random.PRNGKey(0)
    kx, kw, kb = jax.random.split(key, 3)

    x = jax.random.normal(kx, (B, C, voxel_size, voxel_size, voxel_size),
                          dtype=jnp.float32)
    # Deterministic synthetic params matching nn.Conv3d(C, E, p, stride=p).
    fan_in = C * patch_size ** 3
    weight = jax.random.normal(
        kw, (embed_dim, C, patch_size, patch_size, patch_size),
        dtype=jnp.float32) * (1.0 / jnp.sqrt(fan_in))
    bias = jax.random.normal(kb, (embed_dim,), dtype=jnp.float32) * 0.01

    out = patch_embed_voxel(x, weight, bias, patch_size=patch_size)
    out = jax.block_until_ready(out)

    # Reference check against lax conv (same semantics as nn.Conv3d), with
    # inputs rounded to bf16 to mirror the kernel's default MXU compute dtype.
    xq = x.astype(jnp.bfloat16).astype(jnp.float32)
    wq = weight.astype(jnp.bfloat16).astype(jnp.float32)
    ref = jax.lax.conv_general_dilated(
        xq, wq, window_strides=(patch_size,) * 3, padding="VALID",
        dimension_numbers=("NCDHW", "OIDHW", "NCDHW"),
        precision=jax.lax.Precision.HIGHEST)
    ref = ref + bias.reshape(1, embed_dim, 1, 1, 1)
    ref = ref.reshape(B, embed_dim, -1).transpose(0, 2, 1)

    assert out.shape == (B, (voxel_size // patch_size) ** 3, embed_dim)
    assert jnp.allclose(out, ref, atol=2e-3, rtol=2e-3)

    print("KERNEL_OK")
</pallas_src>

<mosaic_0001>
module attributes {stable_mosaic.version = 11 : i64} {
  func.func @patch_embed_kernel(%arg0: i32, %arg1: memref<32x192xbf16, #tpu.memory_space<vmem>>, %arg2: memref<192x128xbf16, #tpu.memory_space<vmem>>, %arg3: memref<1x128xf32, #tpu.memory_space<vmem>>, %arg4: memref<32x128xf32, #tpu.memory_space<vmem>>) attributes {dimension_semantics = [#tpu.dimension_semantics<parallel>], iteration_bounds = array<i64: 4>, scalar_prefetch = 0 : i64, scratch_operands = 0 : i64, tpu.core_type = #tpu.core_type<tc>, window_params = [{transform_indices = @transform_0, window_bounds = array<i64: 32, 192>}, {pipeline_mode = #tpu.pipeline_mode<synchronous>, transform_indices = @transform_1, window_bounds = array<i64: 192, 128>}, {pipeline_mode = #tpu.pipeline_mode<synchronous>, transform_indices = @transform_2, window_bounds = array<i64: 1, 128>}, {transform_indices = @transform_3, window_bounds = array<i64: 32, 128>}]} {
    %c0 = arith.constant 0 : index
    %c0_0 = arith.constant 0 : index
    %0 = vector.load %arg1[%c0, %c0_0] : memref<32x192xbf16, #tpu.memory_space<vmem>>, vector<32x192xbf16>
    %c0_1 = arith.constant 0 : index
    %c0_2 = arith.constant 0 : index
    %1 = vector.load %arg2[%c0_1, %c0_2] : memref<192x128xbf16, #tpu.memory_space<vmem>>, vector<192x128xbf16>
    %cst = arith.constant dense<0.000000e+00> : vector<32x128xf32>
    %2 = tpu.matmul %0, %1, %cst {dimension_numbers = #tpu.dot_dimension_numbers<[1], [0], [0], [1], [0, 0, 1, 1], [], []>} : vector<32x192xbf16>, vector<192x128xbf16>, vector<32x128xf32> -> vector<32x128xf32>
    %c0_3 = arith.constant 0 : index
    %c0_4 = arith.constant 0 : index
    %3 = vector.load %arg3[%c0_3, %c0_4] : memref<1x128xf32, #tpu.memory_space<vmem>>, vector<1x128xf32>
    %4 = vector.broadcast %3 : vector<1x128xf32> to vector<32x128xf32>
    %5 = arith.addf %2, %4 : vector<32x128xf32>
    %c0_5 = arith.constant 0 : index
    %c0_6 = arith.constant 0 : index
    %6 = vector.load %arg4[%c0_5, %c0_6] : memref<32x128xf32, #tpu.memory_space<vmem>>, vector<32x128xf32>
    tpu.vector_store %arg4[%c0_5, %c0_6], %5 {strides = array<i32>} : memref<32x128xf32, #tpu.memory_space<vmem>>, vector<32x128xf32>,
    return
  }
  func.func @transform_0(%arg0: i32) -> (i32, i32) {
    %c0_i32 = arith.constant 0 : i32
    %c0_i32_0 = arith.constant 0 : i32
    return %arg0, %c0_i32 : i32, i32
  }
  func.func @transform_1(%arg0: i32) -> (i32, i32) {
    %c0_i32 = arith.constant 0 : i32
    %c0_i32_0 = arith.constant 0 : i32
    %c0_i32_1 = arith.constant 0 : i32
    return %c0_i32, %c0_i32_0 : i32, i32
  }
  func.func @transform_2(%arg0: i32) -> (i32, i32) {
    %c0_i32 = arith.constant 0 : i32
    %c0_i32_0 = arith.constant 0 : i32
    %c0_i32_1 = arith.constant 0 : i32
    return %c0_i32, %c0_i32_0 : i32, i32
  }
  func.func @transform_3(%arg0: i32) -> (i32, i32) {
    %c0_i32 = arith.constant 0 : i32
    %c0_i32_0 = arith.constant 0 : i32
    return %arg0, %c0_i32 : i32, i32
  }
}

</mosaic_0001>

<bundles_post_ra>
// kernel: patch_embed_voxel.1
= control target key start
LH: loop header
LB: loop body
LE: loop exit
PB: predicated region body
PF: predicated region fallthrough
CT: control target
= control target key end

     0   :  { %8 = vsyncpa [#allocation3], 0  ;;  %s783_s0 = inlined_call_operand.vmem [shape: bf16[128,192], index: 0, kind: input, shape index: {}]   ;;  %s784_s1 = inlined_call_operand.vmem [shape: bf16[192,128], index: 1, kind: input, shape index: {}]   ;;  %s785_s2 = inlined_call_operand.vmem [shape: f32[1,128], index: 2, kind: input, shape index: {}]   ;;  %s786_s3 = inlined_call_operand.hbm [shape: f32[128,128], index: 3, kind: output, shape index: {}]  }
   0x1   :  { %10 = vsyncpa [#allocation3 + $0x1], 0  ;;  %s658_s12 = smov 0   ;;  %s660_s13 = smov 0  }
   0x2   :  { %s662_s14 = smov 0   ;;  %s664_s15 = smov 0  }
   0x3 LB: > { %s679_s16 = sadd.s32 4294967295, %s634_s15   ;;  %s425_s17 = sadd.s32 4294967294, %s634_s15   ;;  %s634_s15 = sphi %s664_s15, %s792_s15   ;;  %s630_s14 = sphi %s662_s14, %s791_s14   ;;  %s626_s13 = sphi %s660_s13, %s790_s13   ;;  %s622_s12 = sphi %s658_s12, %s789_s12  }
   0x4   : > { %s683_s18 = sadd.s32 1, %s634_s15   ;;  %s91_s19 = sadd.s32 1, %s630_s14 }
   0x5   : > { %s88_s20 = ssub.s32 %s634_s15, %s683_s18  ;;  %p101_p0 = scmp.ne.s32.totalorder %s630_s14, %s626_s13 }
   0x6   : > { %p89_p1 = scmp.eq.s32.totalorder %s88_s20, 0  ;;  %p102_p2 = scmp.eq.s32.totalorder %s679_s16, 3 }
   0x7   : > { %p107_p3 = scmp.ne.s32.totalorder %s626_s13, %s622_s12  ;;  %p108_p4 = scmp.eq.s32.totalorder %s425_s17, 3 }
   0x8   : > { %s694_s21 = scalar_select %p89_p1, %s630_s14, %s91_s19  }
   0x9   : > { %p696_p5 = por %p102_p2, %p101_p0  ;;  %p700_p6 = por %p108_p4, %p107_p3 }
   0xa   : > { %p428_p7 = scmp.ge.s32.totalorder %s634_s15, 1  ;;  %p142_p8 = scmp.lt.s32.totalorder %s634_s15, 5 }
   0xc   : > { %p143_p9 = pnand %p428_p7, %p142_p8 }
   0xd   : > { %s430_s28 = sshll.u32 (!%p143_p9), %s679_s16, 2  ;;  %s164_s8 = sand.u32 (!%p143_p9), 1, %s626_s13  }
   0xe   : > { %146 = sbr.rel (%p143_p9) target bundleno = 200 (0xc8), region = 32  ;;  %p168_p10 = scmp.lt.s32.totalorder (!%p143_p9), %s430_s28, 15 }
   0xf   : > { %s429_s11 = sshll.u32 (!%p143_p9), %s164_s8, 5  ;;  %s592_s5 = scalar_lea.hbm (!%p143_p9), %s786_s3, 128 }
  0x10   : > { %s166_s17 = scalar_lea.vmem (!%p143_p9), [#allocation2], %s429_s11 }
  0x11   : > { %s360_s26 = sshll.u32 (!%p143_p9), %s166_s17, 4  ;;  %s361_s26 = int_to_ptr.vmem [resolvable:$true] %s360_s26 }
  0x13   : > { %v516_v0 = vld [vmem:[%s784_s1 + $0x38] sm:$0xff]  ;;  %v515_v2 = vld [vmem:[%s784_s1 + $0x30] sm:$0xff]  ;;  %s794_s28 = smov (!%p168_p10, %s430_s28), 15  ;;  %v514_v4 = vld [vmem:[%s784_s1 + $0x28] sm:$0xff]  ;;  %vm298_vm0 = vcmask 523264  }
  0x14   : > { %v520_v1 = vld [vmem:[%s784_s1 + $0x58] sm:$0xff]  ;;  %305 = vmatpush.bf16.msra.mxu0 %v516_v0  ;;  %522 = vmatpush.bf16.msra.mxu2 %v516_v0  ;;  %v519_v3 = vld [vmem:[%s784_s1 + $0x50] sm:$0xff]  ;;  %s504_s6 = sshll.u32 %s794_s28, 3  ;;  %v518_v5 = vld [vmem:[%s784_s1 + $0x48] sm:$0xff] }
  0x15   : > { %328 = vmatpush.bf16.msra.mxu1 %v520_v1  ;;  %s172_s19 = scalar_lea.vmem %s783_s0, %s504_s6  ;;  %v513_v6 = vld [vmem:[%s784_s1 + $0x20] sm:$0xff]  ;;  %v512_v11 = vld [vmem:[%s784_s1 + $0x18] sm:$0xff]  ;;  %v511_v12 = vld [vmem:[%s784_s1 + $0x10] sm:$0xff] }
  0x16   : > { %v517_v7 = vld [vmem:[%s784_s1 + $0x40] sm:$0xff]  ;;  %v437_v9 = vld [vmem:[%s172_s19 + $0x8] sm:$0xf0]  ;;  %v506_v16 = vld [vmem:[%s172_s19 + $0x4] sm:$0xf0] }
  0x17   : > { %v505_v8 = vld [vmem:[%s172_s19 + $0x4] sm:$0xf]  ;;  %v510_v13 = vld [vmem:[%s784_s1 + $0x8] sm:$0xff]  ;;  %v435_v15 = vld [vmem:[%s172_s19] sm:$0xf] }
  0x18   : > { %306 = vmatpush.bf16.msra.mxu0 %v515_v2  ;;  %523 = vmatpush.bf16.msra.mxu2 %v515_v2  ;;  %v440_v10 = vor.u32 %v505_v8, %v437_v9  ;;  %v509_v14 = vld [vmem:[%s784_s1] sm:$0xff]  ;;  %v443_v17 = vld [vmem:[%s172_s19 + $0x10] sm:$0xf]  ;;  %v508_v18 = vld [vmem:[%s172_s19 + $0x14] sm:$0xf0]  ;;  %v436_v21 = vor.u32 %v506_v16, %v435_v15 }
  0x19   : > { %329 = vmatpush.bf16.msra.mxu1 %v519_v3  ;;  %v507_v19 = vld [vmem:[%s172_s19 + $0x14] sm:$0xf]  ;;  %v445_v20 = vld [vmem:[%s172_s19 + $0x18] sm:$0xf0]  ;;  %v444_v22 = vor.u32 %v508_v18, %v443_v17  ;;  %v571_v26 = vld [vmem:[%s785_s2] ss:$0 sm:$0xff] }
  0x1a   : > { %v448_v23 = vor.u32 %v507_v19, %v445_v20  ;;  %s521_s19 = sshll.u32 %s679_s16, 5  ;;  %s348_s16 = scalar_lea.sflag [#allocation3], %s164_s8 }
  0x1b   : > { %s359_s25 = scalar_lea.hbm %s786_s3, %s521_s19 }
  0x1c   : > { %307 = vmatpush.bf16.msra.mxu0 %v514_v4  ;;  %524 = vmatpush.bf16.msra.mxu2 %v514_v4  ;;  %s362_s27 = sshll.u32 %s359_s25, 4  ;;  %s363_s27 = int_to_ptr.hbm [resolvable:$true] %s362_s27 }
  0x1d   : > { %330 = vmatpush.bf16.msra.mxu1 %v518_v5  ;;  %s586_s28 = sshra.s32 %s363_s27, 4  ;;  %s587_s28 = int_to_ptr.hbm [resolvable:$true] %s586_s28 }
  0x1e   : > { %s588_s29 = scalar_lea.hbm %s587_s28, 32  ;;  %p593_p0 = scmp.lt.s32.totalorder %s587_s28, %s786_s3 }
  0x1f   : > { %p589_p11 = scmp.ne.s32.totalorder %s587_s28, %s588_s29  ;;  %p594_p1 = scmp.lt.s32.totalorder %s592_s5, %s588_s29 }
  0x20   : > { %308 = vmatpush.bf16.msra.mxu0 %v513_v6  ;;  %525 = vmatpush.bf16.msra.mxu2 %v513_v6 }
  0x21   : > { %331 = vmatpush.bf16.msra.mxu1 %v517_v7  ;;  %p590_p12 = pnand %p589_p11, %p696_p5  ;;  %p595_p2 = por %p594_p1, %p593_p0 }
  0x23   : > { %p591_p13 = pneg %p590_p12 }
  0x24   : > { %497 = vmatmul.msk.bf16.vlgmr.msra.gmra.mxu1 %vm298_vm0, %v440_v10  ;;  %309 = vmatpush.bf16.msra.mxu0 %v512_v11 }
  0x25   : > { %526 = vmatpush.bf16.msra.mxu2 %v512_v11  ;;  %p596_p3 = pnand %p595_p2, %p591_p13 }
  0x28   : > { %310 = vmatpush.bf16.msra.mxu0 %v511_v12 }
  0x29   : > { %527 = vmatpush.bf16.msra.mxu2 %v511_v12 }
  0x2c   : > { %311 = vmatpush.bf16.msra.mxu0 %v510_v13 }
  0x2d   : > { %528 = vmatpush.bf16.msra.mxu2 %v510_v13 }
  0x30   : > { %312 = vmatpush.bf16.msra.mxu0 %v509_v14 }
  0x31   : > { %529 = vmatpush.bf16.msra.mxu2 %v509_v14 }
  0x33   : > { %313 = vmatmul.bf16.vlgmr.msra.gmra.mxu0 %v436_v21 }
  0x34   : > { %318 = vmatmul.bf16.vlgmr.msra.gmra.mxu2 %v444_v22  ;;  %498 = vmatmul.msk.bf16.gmra.mxu1 %vm298_vm0, %v448_v23 }
  0xa1   : > { %v333_v24 = vpop.f32.mrf.mxu1 }
  0xa9   : > { %v335_v25 = vpop.f32.mrf.mxu1 }
  0xb0   : > { %v314_v27 = vpop.f32.mrf.mxu0 }
  0xb1   : > { %v315_v28 = vadd.f32 %v571_v26, %v314_v27  ;;  %v338_v30 = vpop.f32.mrf.mxu1 }
  0xb3   : > { %v334_v29 = vadd.f32 %v333_v24, %v315_v28 }
  0xb5   : > { %343 = vst [vmem:[%s166_s17] sm:$0xff] %v334_v29 }
  0xb7   : > { %v319_v31 = vpop.f32.mrf.mxu2 }
  0xb8   : > { %v320_v32 = vadd.f32 %v571_v26, %v319_v31  ;;  %v316_v33 = vpop.f32.mrf.mxu0 }
  0xb9   : > { %v317_v34 = vadd.f32 %v571_v26, %v316_v33  ;;  %v340_v39 = vpop.f32.mrf.mxu1 }
  0xba   : > { %v339_v35 = vadd.f32 %v338_v30, %v320_v32 }
  0xbb   : > { %v336_v36 = vadd.f32 %v335_v25, %v317_v34 }
  0xbc   : > { %345 = vst [vmem:[%s166_s17 + $0x10] sm:$0xff] %v339_v35 }
  0xbd   : > { %344 = vst [vmem:[%s166_s17 + $0x8] sm:$0xff] %v336_v36 }
  0xbf   : > { %v321_v37 = vpop.f32.mrf.mxu2 }
  0xc0   : > { %v322_v38 = vadd.f32 %v571_v26, %v321_v37 }
  0xc2   : > { %v341_v40 = vadd.f32 %v340_v39, %v322_v38 }
  0xc4   : > { %346 = vst [vmem:[%s166_s17 + $0x18] sm:$0xff] %v341_v40 }
  0xc5   : > { %599 = shalt.err (!%p596_p3)
}
  0xc6   : > { %s636_s8 = smov 128   ;;  %s637_s9 = smov 8  }
  0xc7   : > { %530 = dma.vmem_to_hbm [thread:$0]  (%p696_p5), %s361_s26, 512, %s363_s27, %s348_s16, %s636_s8, %s636_s8, %s637_s9  }
  0xc8 PF: > { %p536_p4 = scmp.ge.s32.totalorder %s634_s15, 2  ;;  %s377_s10 = sand.u32 1, %s622_s12  }
  0xc9   : > { %s378_s11 = scalar_lea.sflag [#allocation3], %s377_s10 }
  0xca   : > { %p533_p7 = pnand %p536_p4, %p700_p6 }
  0xcc   : > { %p534_p8 = pneg %p533_p7 }
  0xce   : > { %617 = dma.done.wait (%p534_p8), %s378_s11, 512  }
  0xcf   : > { %619 = vsyncadd (%p534_p8), %s378_s11, 4294966784  ;;  %p13_p9 = scmp.ge.s32.totalorder %s683_s18, 6   ;;  %s789_s12 = smov %s626_s13 }
  0xd0   : > { %s790_s13 = smov %s630_s14  ;;  %s791_s14 = smov %s694_s21 }
  0xd1   : > { %s792_s15 = smov %s683_s18  ;;  %15 = sbr.rel (!%p13_p9) target bundleno = 3 (0x3), region = 67 }
  0xd6   :  { %384 = vsyncpa [#allocation3], 1 }
  0xd7   :  { %386 = vsyncpa [#allocation3 + $0x1], 1 }

</bundles_post_ra>
